<compile_context>
chip_gen: v5e
topology: v5e:2x2
jax: 0.10.0
libtpu: 0.0.40
codegen_flags: <defaults>
</compile_context>

<pallas_src>
import jax
import jax.numpy as jnp
from jax.experimental import pallas as pl
from jax.experimental.pallas import tpu as pltpu


def _round_up(x, m):
    return ((x + m - 1) // m) * m


def _fullconnect_kernel(x_ref, w1_ref, b1_ref, w2_ref, b2_ref, o_ref):
    # x_ref:  (TB, F)   f32      w1_ref: (F, Hp)  bf16   b1_ref: (1, Hp) f32
    # w2_ref: (Hp, Ap)  bf16     b2_ref: (1, A)   f32    o_ref:  (TB, A) f32
    # Cast activations to bf16 in-kernel (saves a host-side padding/cast pass).
    x = x_ref[...].astype(jnp.bfloat16)

    # Layer 1: Linear (bf16 MXU, f32 accumulate) + bias + ReLU in f32.
    h = jnp.dot(x, w1_ref[...], preferred_element_type=jnp.float32)
    h = jnp.maximum(h + b1_ref[...], 0.0)

    # Layer 2: Linear on a clean (Hp, Ap) 128-aligned weight tile, then keep
    # only the real action lanes before bias + sigmoid + store (lane-masked
    # store of A=8 lanes is far cheaper than a 16x padded writeback).
    z_full = jnp.dot(h.astype(jnp.bfloat16), w2_ref[...],
                     preferred_element_type=jnp.float32)
    a = o_ref.shape[-1]
    z = z_full[:, :a] + b2_ref[...]

    # Exact sigmoid: exp on EUP, exact reciprocal; z << 0 -> exp=inf -> 1/inf=0.
    o_ref[...] = pl.reciprocal(1.0 + jnp.exp(-z), approx=False).astype(o_ref.dtype)


def _choose_tb(batch, tb_max):
    """Pick the batch tile: large to amortize per-step overhead, multiple of 16
    for layout friendliness, and >= 2 grid steps when possible so both v7x
    TensorCores get sharded work (no-op on single-TC v5e/v6e)."""
    if batch <= 16:
        return batch                      # single exact block (dims == full array)
    tb = min(tb_max, _round_up(batch, 16))
    if batch > tb:
        return tb                         # already >= 2 grid steps
    # Whole batch fits one max tile -> split into (at least) two tiles.
    return _round_up(pl.cdiv(batch, 2), 16)


def prepare_params(w1, b1, w2, b2):
    """One-time parameter prep (NOT per forward call): pad hidden/action dims
    to 128 with zeros (mathematically exact) and cast weights to bf16."""
    feat, hid = w1.shape
    act = w2.shape[1]
    hid_p = _round_up(hid, 128)
    act_p = _round_up(act, 128)
    w1_p = jnp.zeros((feat, hid_p), jnp.bfloat16).at[:, :hid].set(
        w1.astype(jnp.bfloat16))
    b1_p = jnp.zeros((1, hid_p), jnp.float32).at[0, :hid].set(
        b1.astype(jnp.float32))
    w2_p = jnp.zeros((hid_p, act_p), jnp.bfloat16).at[:hid, :act].set(
        w2.astype(jnp.bfloat16))
    b2_p = b2.astype(jnp.float32).reshape(1, act)
    return w1_p, b1_p, w2_p, b2_p


def fullconnect_forward(x, params, *, tb=1024):
    """Pallas implementation of FullConnect.forward.

    x:      any shape whose trailing dims flatten to feature_size (e.g. (B, C, 5, 5))
    params: output of prepare_params(w1, b1, w2, b2)
    returns: (B, action_dim) float32
    """
    w1_p, b1_p, w2_p, b2_p = params
    feat = w1_p.shape[0]
    act = b2_p.shape[-1]

    x2d = x.reshape(-1, feat)              # metadata-only reshape, no HBM pass
    batch = x2d.shape[0]

    tile_b = _choose_tb(batch, tb)
    grid = (pl.cdiv(batch, tile_b),)

    return pl.pallas_call(
        _fullconnect_kernel,
        out_shape=jax.ShapeDtypeStruct((batch, act), jnp.float32),
        grid=grid,
        in_specs=[
            # x: tiled over batch; last block dim == full array dim (100) is legal.
            pl.BlockSpec((tile_b, feat), lambda i: (i, 0)),
            # Weights/biases: constant index_map -> fetched once, VMEM-resident.
            pl.BlockSpec(w1_p.shape, lambda i: (0, 0)),
            pl.BlockSpec(b1_p.shape, lambda i: (0, 0)),
            pl.BlockSpec(w2_p.shape, lambda i: (0, 0)),
            pl.BlockSpec(b2_p.shape, lambda i: (0, 0)),
        ],
        # Unpadded output: (TB, A) with A == full last dim -> 16x less writeback.
        out_specs=pl.BlockSpec((tile_b, act), lambda i: (i, 0)),
        compiler_params=pltpu.CompilerParams(
            dimension_semantics=("parallel",)),
    )(x2d, w1_p, b1_p, w2_p, b2_p)


def init_params(key, state_dim, action_dim, n_hidden):
    """Deterministic init mimicking nn.Linear default (uniform +-1/sqrt(fan_in)).
    Stored already transposed to (in, out) layout for the kernel."""
    feature_size = state_dim * 25
    k1, k2, k3, k4 = jax.random.split(key, 4)
    bound1 = 1.0 / jnp.sqrt(feature_size)
    bound2 = 1.0 / jnp.sqrt(n_hidden)
    w1 = jax.random.uniform(k1, (feature_size, n_hidden), jnp.float32, -bound1, bound1)
    b1 = jax.random.uniform(k2, (n_hidden,), jnp.float32, -bound1, bound1)
    w2 = jax.random.uniform(k3, (n_hidden, action_dim), jnp.float32, -bound2, bound2)
    b2 = jax.random.uniform(k4, (action_dim,), jnp.float32, -bound2, bound2)
    return w1, b1, w2, b2


if __name__ == "__main__":
    state_dim = 4
    action_dim = 8
    n_hidden = 32
    batch = 2
    feature_size = state_dim * 25  # 100

    key = jax.random.PRNGKey(0)
    kx, kp = jax.random.split(key)
    # Input laid out like the PyTorch module expects: (B, state_dim, 5, 5)
    x = jax.random.normal(kx, (batch, state_dim, 5, 5), jnp.float32)

    w1, b1, w2, b2 = init_params(kp, state_dim, action_dim, n_hidden)
    params = prepare_params(w1, b1, w2, b2)   # one-time pad + bf16 cast

    out = fullconnect_forward(x, params)
    out = jax.block_until_ready(out)

    # Reference in plain f32 JAX (kernel uses bf16 weights/activations on the
    # MXU, hence the tolerance; sigmoid itself is exact).
    x2d = x.reshape(-1, feature_size)
    ref = jax.nn.sigmoid(jnp.maximum(x2d @ w1 + b1, 0.0) @ w2 + b2)
    assert out.shape == (batch, action_dim)
    err = jnp.max(jnp.abs(out - ref))
    assert jnp.allclose(out, ref, atol=2e-2, rtol=2e-2), f"max abs err {err}"

    print("KERNEL_OK")
</pallas_src>

<mosaic_0001>
module attributes {stable_mosaic.version = 11 : i64} {
  func.func @_fullconnect_kernel(%arg0: i32, %arg1: memref<2x100xf32, #tpu.memory_space<vmem>>, %arg2: memref<100x128xbf16, #tpu.memory_space<vmem>>, %arg3: memref<1x128xf32, #tpu.memory_space<vmem>>, %arg4: memref<128x128xbf16, #tpu.memory_space<vmem>>, %arg5: memref<1x8xf32, #tpu.memory_space<vmem>>, %arg6: memref<2x8xf32, #tpu.memory_space<vmem>>) attributes {dimension_semantics = [#tpu.dimension_semantics<parallel>], iteration_bounds = array<i64: 1>, scalar_prefetch = 0 : i64, scratch_operands = 0 : i64, tpu.core_type = #tpu.core_type<tc>, window_params = [{transform_indices = @transform_0, window_bounds = array<i64: 2, 100>}, {pipeline_mode = #tpu.pipeline_mode<synchronous>, transform_indices = @transform_1, window_bounds = array<i64: 100, 128>}, {pipeline_mode = #tpu.pipeline_mode<synchronous>, transform_indices = @transform_2, window_bounds = array<i64: 1, 128>}, {pipeline_mode = #tpu.pipeline_mode<synchronous>, transform_indices = @transform_3, window_bounds = array<i64: 128, 128>}, {pipeline_mode = #tpu.pipeline_mode<synchronous>, transform_indices = @transform_4, window_bounds = array<i64: 1, 8>}, {transform_indices = @transform_5, window_bounds = array<i64: 2, 8>}]} {
    %c0 = arith.constant 0 : index
    %c0_0 = arith.constant 0 : index
    %0 = vector.load %arg1[%c0, %c0_0] : memref<2x100xf32, #tpu.memory_space<vmem>>, vector<2x100xf32>
    %1 = arith.truncf %0 : vector<2x100xf32> to vector<2x100xbf16>
    %c0_1 = arith.constant 0 : index
    %c0_2 = arith.constant 0 : index
    %2 = vector.load %arg2[%c0_1, %c0_2] : memref<100x128xbf16, #tpu.memory_space<vmem>>, vector<100x128xbf16>
    %cst = arith.constant dense<0.000000e+00> : vector<2x128xf32>
    %3 = tpu.matmul %1, %2, %cst {dimension_numbers = #tpu.dot_dimension_numbers<[1], [0], [0], [1], [0, 0, 1, 1], [], []>} : vector<2x100xbf16>, vector<100x128xbf16>, vector<2x128xf32> -> vector<2x128xf32>
    %c0_3 = arith.constant 0 : index
    %c0_4 = arith.constant 0 : index
    %4 = vector.load %arg3[%c0_3, %c0_4] : memref<1x128xf32, #tpu.memory_space<vmem>>, vector<1x128xf32>
    %5 = vector.broadcast %4 : vector<1x128xf32> to vector<2x128xf32>
    %6 = arith.addf %3, %5 : vector<2x128xf32>
    %cst_5 = arith.constant 0.000000e+00 : f32
    %7 = vector.broadcast %cst_5 : f32 to vector<2x128xf32>
    %8 = arith.maximumf %6, %7 : vector<2x128xf32>
    %9 = arith.truncf %8 : vector<2x128xf32> to vector<2x128xbf16>
    %c0_6 = arith.constant 0 : index
    %c0_7 = arith.constant 0 : index
    %10 = vector.load %arg4[%c0_6, %c0_7] : memref<128x128xbf16, #tpu.memory_space<vmem>>, vector<128x128xbf16>
    %cst_8 = arith.constant dense<0.000000e+00> : vector<2x128xf32>
    %11 = tpu.matmul %9, %10, %cst_8 {dimension_numbers = #tpu.dot_dimension_numbers<[1], [0], [0], [1], [0, 0, 1, 1], [], []>} : vector<2x128xbf16>, vector<128x128xbf16>, vector<2x128xf32> -> vector<2x128xf32>
    %12 = vector.extract_strided_slice %11 {offsets = [0, 0], sizes = [2, 8], strides = [1, 1]} : vector<2x128xf32> to vector<2x8xf32>
    %c0_9 = arith.constant 0 : index
    %c0_10 = arith.constant 0 : index
    %13 = vector.load %arg5[%c0_9, %c0_10] : memref<1x8xf32, #tpu.memory_space<vmem>>, vector<1x8xf32>
    %14 = vector.broadcast %13 : vector<1x8xf32> to vector<2x8xf32>
    %15 = arith.addf %12, %14 : vector<2x8xf32>
    %cst_11 = arith.constant 0.000000e+00 : f32
    %16 = vector.broadcast %cst_11 : f32 to vector<2x8xf32>
    %17 = arith.subf %16, %15 : vector<2x8xf32>
    %18 = math.exp %17 : vector<2x8xf32>
    %cst_12 = arith.constant 1.000000e+00 : f32
    %19 = vector.broadcast %cst_12 : f32 to vector<2x8xf32>
    %20 = arith.addf %19, %18 : vector<2x8xf32>
    %21 = tpu.reciprocal %20 : vector<2x8xf32> -> vector<2x8xf32>
    %c0_13 = arith.constant 0 : index
    %c0_14 = arith.constant 0 : index
    %22 = vector.load %arg6[%c0_13, %c0_14] : memref<2x8xf32, #tpu.memory_space<vmem>>, vector<2x8xf32>
    tpu.vector_store %arg6[%c0_13, %c0_14], %21 {strides = array<i32>} : memref<2x8xf32, #tpu.memory_space<vmem>>, vector<2x8xf32>,
    return
  }
  func.func @transform_0(%arg0: i32) -> (i32, i32) {
    %c0_i32 = arith.constant 0 : i32
    %c0_i32_0 = arith.constant 0 : i32
    return %arg0, %c0_i32 : i32, i32
  }
  func.func @transform_1(%arg0: i32) -> (i32, i32) {
    %c0_i32 = arith.constant 0 : i32
    %c0_i32_0 = arith.constant 0 : i32
    %c0_i32_1 = arith.constant 0 : i32
    return %c0_i32, %c0_i32_0 : i32, i32
  }
  func.func @transform_2(%arg0: i32) -> (i32, i32) {
    %c0_i32 = arith.constant 0 : i32
    %c0_i32_0 = arith.constant 0 : i32
    %c0_i32_1 = arith.constant 0 : i32
    return %c0_i32, %c0_i32_0 : i32, i32
  }
  func.func @transform_3(%arg0: i32) -> (i32, i32) {
    %c0_i32 = arith.constant 0 : i32
    %c0_i32_0 = arith.constant 0 : i32
    %c0_i32_1 = arith.constant 0 : i32
    return %c0_i32, %c0_i32_0 : i32, i32
  }
  func.func @transform_4(%arg0: i32) -> (i32, i32) {
    %c0_i32 = arith.constant 0 : i32
    %c0_i32_0 = arith.constant 0 : i32
    %c0_i32_1 = arith.constant 0 : i32
    return %c0_i32, %c0_i32_0 : i32, i32
  }
  func.func @transform_5(%arg0: i32) -> (i32, i32) {
    %c0_i32 = arith.constant 0 : i32
    %c0_i32_0 = arith.constant 0 : i32
    return %arg0, %c0_i32 : i32, i32
  }
}

</mosaic_0001>

<bundles_post_ra>
// kernel: tpu_custom_call.1
= control target key start
LH: loop header
LB: loop body
LE: loop exit
PB: predicated region body
PF: predicated region fallthrough
CT: control target
= control target key end

     0   :  { %10 = vsyncpa [#allocation3], 0  ;;  %s507_s0 = inlined_call_operand.hbm [shape: f32[2,100], index: 0, kind: input, shape index: {}]   ;;  %s508_s1 = inlined_call_operand.hbm [shape: bf16[100,128], index: 1, kind: input, shape index: {}]   ;;  %s509_s2 = inlined_call_operand.vmem [shape: f32[1,128], index: 2, kind: input, shape index: {}]   ;;  %s510_s3 = inlined_call_operand.hbm [shape: bf16[128,128], index: 3, kind: input, shape index: {}]   ;;  %s511_s4 = inlined_call_operand.vmem [shape: f32[1,8], index: 4, kind: input, shape index: {}]   ;;  %s512_s5 = inlined_call_operand.hbm [shape: f32[2,8], index: 5, kind: output, shape index: {}]  }
   0x1   :  { %11 = vsyncpa [#allocation6], 0  ;;  %s28_s20 = sshll.u32 %s508_s1, 4  ;;  %s29_s20 = int_to_ptr.hbm [resolvable:$true] %s28_s20 }
   0x2   :  { %12 = vsyncpa [#allocation4], 0  ;;  %s453_s21 = smov [#allocation5]   ;;  %s18_s25 = sshll.u32 %s507_s0, 4  ;;  %s19_s25 = int_to_ptr.hbm [resolvable:$true] %s18_s25 }
   0x3   :  { %s30_s22 = sshll.u32 %s453_s21, 4  ;;  %s454_s26 = smov 64   ;;  %s31_s22 = int_to_ptr.vmem [resolvable:$true] %s30_s22 }
   0x4   :  { %s455_s27 = smov 4   ;;  %s456_s28 = smov [#allocation2]  }
   0x5   :  { %36 = dma.hbm_to_vmem [thread:$0]  %s29_s20, 832, %s31_s22, [#allocation6], %s454_s26, %s454_s26, %s455_s27  }
   0x6   :  { %s20_s29 = sshll.u32 %s456_s28, 4  ;;  %s43_s7 = sshll.u32 %s510_s3, 4  ;;  %s21_s29 = int_to_ptr.vmem [resolvable:$true] %s20_s29  ;;  %s44_s7 = int_to_ptr.hbm [resolvable:$true] %s43_s7 }
   0x7   :  { %23 = dma.hbm_to_vmem [thread:$0]  %s19_s25, 32, %s21_s29, [#allocation3]  }
   0x8   :  { %s457_s1 = smov [#allocation7]  }
   0x9   :  { %s45_s8 = sshll.u32 %s457_s1, 4  ;;  %s46_s8 = int_to_ptr.vmem [resolvable:$true] %s45_s8 }
   0xa   :  { %51 = dma.hbm_to_vmem [thread:$0]  %s44_s7, 1024, %s46_s8, [#allocation6], %s454_s26, %s454_s26, %s455_s27  }
   0xb   :  { %447 = dma.done.wait [#allocation3], 32  }
   0xc   :  { %448 = vsyncadd [#allocation3], 4294967264 }
   0xd   :  { %449 = dma.done.wait [#allocation6], 1856  }
   0xe   :  { %450 = vsyncadd [#allocation6], 4294965440  ;;  %v81_v0 = vld [vmem:[#allocation5 + $0x30] sm:$0x3]  ;;  %vm129_vm0 = vcmask 1041408   ;;  %v337_v4 = vld [vmem:[#allocation7 + $0x30] sm:$0xff] }
   0xf   :  { %v111_v1 = vunpack.c.l.b16 %v81_v0  ;;  %v338_v2 = vld [vmem:[#allocation7 + $0x38] sm:$0xff]  ;;  %v336_v7 = vld [vmem:[#allocation7 + $0x28] sm:$0xff]  ;;  %v335_v9 = vld [vmem:[#allocation7 + $0x20] sm:$0xff]  ;;  %vm125_vm1 = vcmask 818176   ;;  %s257_s13 = sshll.u32 %s512_s5, 4  ;;  %vm248_vm5 = vcmask 58368   ;;  %s258_s13 = int_to_ptr.hbm [resolvable:$true] %s257_s13 }
  0x10   :  { %212 = vmatpush.bf16.msra.mxu1 %v338_v2  ;;  %v330_v6 = vld [vmem:[#allocation5 + $0x28] sm:$0xff]  ;;  %v329_v8 = vld [vmem:[#allocation5 + $0x20] sm:$0xff]  ;;  %v328_v10 = vld [vmem:[#allocation5 + $0x18] sm:$0xff] }
  0x11   :  { %v118_v3 = vpack.c.b16 %v111_v1, %v111_v1  ;;  %v334_v11 = vld [vmem:[#allocation7 + $0x18] sm:$0xff]  ;;  %v333_v13 = vld [vmem:[#allocation7 + $0x10] sm:$0xff]  ;;  %v67_v16 = vld [vmem:[#allocation2] sm:$0x3] }
  0x12   :  { %v327_v12 = vld [vmem:[#allocation5 + $0x10] sm:$0xff]  ;;  %v326_v14 = vld [vmem:[#allocation5 + $0x8] sm:$0xff]  ;;  %v325_v15 = vld [vmem:[#allocation5] sm:$0xff]  ;;  %v68_v17 = vpack.c.bf16 %v67_v16, %v67_v16 }
  0x13   :  { %v131_v5 = vsel %vm129_vm0, %v118_v3, 0  ;;  %v332_v18 = vld [vmem:[#allocation7 + $0x8] sm:$0xff]  ;;  %v331_v19 = vld [vmem:[#allocation7] sm:$0xff] }
  0x14   :  { %134 = vmatpush.bf16.msra.mxu0 %v131_v5  ;;  %213 = vmatpush.bf16.msra.mxu1 %v337_v4  ;;  %v345_v20 = vld [vmem:[%s509_s2] ss:$0 sm:$0xff]  ;;  %s458_s2 = smov [#allocation8]  }
  0x15   :  { %v346_v26 = vld [vmem:[%s511_s4] ss:$0 sm:$0xff]  ;;  %s255_s11 = sshll.u32 %s458_s2, 4  ;;  %s256_s11 = int_to_ptr.vmem [resolvable:$true] %s255_s11 }
  0x18   :  { %135 = vmatpush.bf16.msra.mxu0 %v330_v6  ;;  %214 = vmatpush.bf16.msra.mxu1 %v336_v7 }
  0x1c   :  { %136 = vmatpush.bf16.msra.mxu0 %v329_v8  ;;  %215 = vmatpush.bf16.msra.mxu1 %v335_v9 }
  0x20   :  { %137 = vmatpush.bf16.msra.mxu0 %v328_v10  ;;  %216 = vmatpush.bf16.msra.mxu1 %v334_v11 }
  0x24   :  { %138 = vmatpush.bf16.msra.mxu0 %v327_v12  ;;  %217 = vmatpush.bf16.msra.mxu1 %v333_v13 }
  0x28   :  { %139 = vmatpush.bf16.msra.mxu0 %v326_v14  ;;  %218 = vmatpush.bf16.msra.mxu1 %v332_v18 }
  0x2c   :  { %140 = vmatpush.bf16.msra.mxu0 %v325_v15  ;;  %219 = vmatpush.bf16.msra.mxu1 %v331_v19 }
  0x2f   :  { %292 = vmatmul.msk.bf16.vlgmr.msra.gmra.mxu0 %vm125_vm1, %v68_v17 }
  0xac   :  { %v142_v21 = vpop.f32.mrf.mxu0 }
  0xad   :  { %v143_v22 = vadd.f32 %v345_v20, %v142_v21 }
  0xaf   :  { %v146_v23 = vmax.f32 %v143_v22, 0.0 }
  0xb1   :  { %v147_v24 = vpack.c.bf16 %v146_v23, %v146_v23 }
  0xb3   :  { %220 = vmatmul.bf16.vlgmr.msra.gmra.mxu1 %v147_v24 }
  0xb4   :  { %v144_v25 = vpop.f32.mrf.mxu0 }
 0x130   :  { %v221_v27 = vpop.f32.mrf.mxu1 }
 0x131   :  { %v229_v28 = vadd.f32 %v346_v26, %v221_v27 }
 0x133   :  { %v230_v29 = vsub.f32 0.0, %v229_v28 }
 0x135   :  { %v231_v30 = vmul.f32 1.442695, %v230_v29 }
 0x137   :  { %347 = vpow2.f32 %v231_v30 }
 0x138   :  { %v223_v31 = vpop.f32.mrf.mxu1 }
 0x13d   :  { %v348_v32 = vpop.eup %347 }
 0x13e   :  { %v233_v33 = vadd.f32 1.0, %v348_v32 }
 0x140   :  { %349 = vrcp.f32 %v233_v33  ;;  %v245_v37 = vand.u32 2147483648, %v233_v33  ;;  %v243_v39 = vand.u32 2147483647, %v233_v33  ;;  %vm239_vm3 = vweird.f32 %v233_v33 }
 0x142   :  { %v246_v41 = vor.u32 1.1754944e-38, %v245_v37  ;;  %vm244_vm6 = vcmp.eq.f32.partialorder %v243_v39, 8.507059e+37 }
 0x146   :  { %v350_v34 = vpop.eup %349 }
 0x147   :  { %v235_v35 = vmul.f32 %v350_v34, %v233_v33  ;;  %vm240_vm2 = vweird.f32 %v350_v34 }
 0x148   :  { %vm241_vm4 = vmor %vm239_vm3, %vm240_vm2 }
 0x149   :  { %v236_v36 = vsub.f32 1.0, %v235_v35 }
 0x14b   :  { %v237_v38 = vmul.f32 %v350_v34, %v236_v36 }
 0x14d   :  { %v238_v40 = vadd.f32 %v350_v34, %v237_v38 }
 0x14f   :  { %v242_v42 = vsel %vm241_vm4, %v350_v34, %v238_v40 }
 0x150   :  { %v247_v43 = vsel %vm244_vm6, %v246_v41, %v242_v42 }
 0x151   :  { %249 = vst.msk [vmem:[#allocation8] sm:$0x3] %vm248_vm5, %v247_v43 }
 0x152   :  { %260 = dma.vmem_to_hbm [thread:$0]  %s256_s11, 32, %s258_s13, [#allocation4]  }
 0x153   :  { %451 = dma.done.wait [#allocation4], 32  }
 0x154   :  { %452 = vsyncadd [#allocation4], 4294967264 }
 0x155   :  { %265 = vsyncpa [#allocation3], 1 }
 0x156   :  { %266 = vsyncpa [#allocation6], 1 }
 0x157   :  { %267 = vsyncpa [#allocation4], 1 }

</bundles_post_ra>
